<compile_context>
chip_gen: v5e
topology: v5e:2x2
jax: 0.10.0
libtpu: 0.0.40
codegen_flags: <defaults>
</compile_context>

<pallas_src>
import jax
import jax.numpy as jnp
from jax.experimental import pallas as pl
from jax.experimental.pallas import tpu as pltpu


def _vmem_capacity_bytes():
    """Physical VMEM per TensorCore (generation-aware), conservative fallback."""
    try:
        return int(pltpu.get_tpu_info().vmem_capacity_bytes)
    except Exception:
        return 64 << 20  # assume v7x (smallest physical VMEM)


def _choose_token_chunk(T, D):
    """Token-chunk size for the in-kernel passes; bounds f32 temps to the chunk."""
    if T * D * 4 <= (2 << 20):                 # whole-row f32 temp is already small
        return T
    tc = ((2 << 20) // (D * 4)) // 128 * 128   # lane-aligned chunk
    return int(max(128, min(tc, T)))


def _footprint_bytes(bt, T, D, itemsize, t_chunk):
    """Peak VMEM estimate for one grid step at batch tile bt."""
    return (2 * bt * T * D * itemsize          # double-buffered input block
            + bt * T * 4                       # scores/weights scratch (f32)
            + bt * D * 4                       # f32 accumulator scratch
            + 2 * bt * D * itemsize            # double-buffered output block
            + 3 * bt * t_chunk * D * 4)        # in-body f32 chunk temporaries


def _choose_batch_tile(B, T, D, itemsize, t_chunk, vmem_budget):
    """Batch rows per grid step: ~4 MiB input blocks, checked against VMEM budget."""
    row_in = T * D * itemsize
    target_block = 4 << 20                     # ~4 MiB single-buffer input block
    bt = max(1, target_block // row_in)
    bt = min(bt, B)
    if bt < B and bt >= 8:
        bt = (bt // 8) * 8                     # sublane-aligned partial blocks
    # Re-check the *full* footprint (input bufs + scratch + chunk temps + output).
    while bt > 1 and _footprint_bytes(bt, T, D, itemsize, t_chunk) > vmem_budget:
        bt = max(1, bt // 2)
        if bt < B and bt >= 8:
            bt = (bt // 8) * 8

    # Megacore balance (v7x has 2 TCs, grid axis is "parallel"): prefer an even
    # number of grid steps when a slightly smaller tile (never < bt/2) gives one.
    # On single-TC chips (v5e/v6e) the extra ~0.35us/step cost is negligible.
    if B > bt:
        steps = -(-B // bt)
        if steps % 2 == 1 and bt >= 16:
            cand = bt - 8
            while cand >= max(8, bt // 2):
                if (-(-B // cand)) % 2 == 0:
                    bt = cand
                    break
                cand -= 8
    return int(max(1, bt))


def _make_kernel(T, t_chunk, lowp):
    n_full = T // t_chunk
    t_tail = T - n_full * t_chunk
    single = (n_full == 1 and t_tail == 0)

    def kernel(x_ref, w_ref, o_ref, s_ref, acc_ref):
        # x_ref: (Bt, T, D) x-dtype   w_ref: (1, D) compute dtype
        # o_ref: (Bt, D) x-dtype      s_ref: (Bt, T) f32   acc_ref: (Bt, D) f32
        w = w_ref[...]

        # ---- pass 1: attention scores, lane-dense (Bt, T) ------------------
        def score_block(off, size):
            xc = x_ref[:, pl.ds(off, size), :]                  # (Bt, size, D)
            prod = xc * w                                       # VPU mul in x dtype
            s_ref[:, pl.ds(off, size)] = jnp.sum(
                prod.astype(jnp.float32), axis=-1)              # f32 lane reduce
            # Linear bias omitted: a per-token constant cancels in the softmax.

        if single:
            score_block(0, T)
        else:
            if n_full > 0:
                @pl.loop(0, n_full)
                def _(c):
                    score_block(pl.multiple_of(c * t_chunk, t_chunk), t_chunk)
            if t_tail:
                score_block(n_full * t_chunk, t_tail)

        # ---- softmax over tokens (tiny (Bt, T) f32) -------------------------
        # Note: padded rows of a partial last block read stale VMEM; any
        # exp/softmax garbage stays confined to those rows and their stores
        # are masked, so real rows are unaffected.
        s = s_ref[...]
        m = jnp.max(s, axis=-1, keepdims=True)                  # (Bt, 1)
        p = jnp.exp(s - m)
        denom = jnp.sum(p, axis=-1, keepdims=True)              # (Bt, 1)
        # exact reciprocal: denom is only (Bt, 1); approx would cost accuracy.
        s_ref[...] = p * pl.reciprocal(denom, approx=False)     # now holds weights

        # ---- pass 2: weighted sum over tokens --------------------------------
        acc_ref[...] = jnp.zeros_like(acc_ref)

        def pool_block(off, size):
            xc = x_ref[:, pl.ds(off, size), :]                  # (Bt, size, D)
            wc = s_ref[:, pl.ds(off, size)]                     # (Bt, size) f32
            if lowp:
                prod = xc * wc.astype(xc.dtype)[:, :, None]     # bf16 mul: 2x VPU rate
            else:
                prod = xc * wc[:, :, None]                      # f32 path, no upcast pass
            acc_ref[...] += jnp.sum(prod.astype(jnp.float32), axis=1)

        if single:
            pool_block(0, T)
        else:
            if n_full > 0:
                @pl.loop(0, n_full)
                def _(c):
                    pool_block(pl.multiple_of(c * t_chunk, t_chunk), t_chunk)
            if t_tail:
                pool_block(n_full * t_chunk, t_tail)

        o_ref[...] = acc_ref[...].astype(o_ref.dtype)

    return kernel


def attention_pool2(x, w, b=None):
    """AttentionPool2 forward.

    x: (..., T, D); w: (D,) = nn.Linear(D, 1).weight; b: () bias.
    The bias adds the same constant to every token's score and therefore
    cancels in the softmax over tokens; accepted for API parity, never read.
    """
    *lead, T, D = x.shape
    B = 1
    for s in lead:
        B *= int(s)
    x3 = x.reshape(B, T, D)

    lowp = jnp.issubdtype(x3.dtype, jnp.floating) and x3.dtype.itemsize == 2
    compute_dtype = x3.dtype if lowp else jnp.float32
    w2 = jnp.asarray(w).reshape(1, D).astype(compute_dtype)

    itemsize = x3.dtype.itemsize
    t_chunk = _choose_token_chunk(T, D)
    phys_vmem = _vmem_capacity_bytes()
    bt = _choose_batch_tile(B, T, D, itemsize, t_chunk, vmem_budget=phys_vmem // 2)
    grid = (pl.cdiv(B, bt),)

    footprint = _footprint_bytes(bt, T, D, itemsize, t_chunk)
    # Stay well under physical VMEM (64 MiB/TC on v7x, 128 MiB on v5e/v6e).
    vmem_limit = int(min(phys_vmem * 3 // 4, max(32 << 20, 2 * footprint)))

    cost = pl.CostEstimate(
        flops=4 * B * T * D,
        transcendentals=B * T,
        bytes_accessed=B * T * D * itemsize + B * D * itemsize + D * w2.dtype.itemsize,
    )

    kernel = _make_kernel(T, t_chunk, lowp)

    # TODO(synk): if production D < 128, fold k batch rows into lanes for a
    # lane-dense output block (avoids masked vst on the tiny (Bt, D) writeback).
    # TODO(synk): if a profile shows exposed DMA with these small blocks, sweep
    # pipeline_mode=pl.Buffered(3) on the input BlockSpec.
    out = pl.pallas_call(
        kernel,
        out_shape=jax.ShapeDtypeStruct((B, D), x.dtype),
        grid_spec=pltpu.PrefetchScalarGridSpec(
            num_scalar_prefetch=0,
            grid=grid,
            in_specs=[
                pl.BlockSpec((bt, T, D), lambda i: (i, 0, 0)),
                pl.BlockSpec((1, D), lambda i: (0, 0)),
            ],
            out_specs=pl.BlockSpec((bt, D), lambda i: (i, 0)),
            scratch_shapes=[
                pltpu.VMEM((bt, T), jnp.float32),   # scores -> weights (lane-dense)
                pltpu.VMEM((bt, D), jnp.float32),   # pooled f32 accumulator
            ],
        ),
        compiler_params=pltpu.CompilerParams(
            dimension_semantics=("parallel",),
            vmem_limit_bytes=vmem_limit,
        ),
        cost_estimate=cost,
    )(x3, w2)

    return out.reshape(*lead, D)


def attention_pool2_ref(x, w, b):
    xf = x.astype(jnp.float32)
    scores = jnp.einsum('...td,d->...t', xf, w.astype(jnp.float32))[..., None] + b
    weights = jax.nn.softmax(scores, axis=-2)
    return jnp.sum(weights * xf, axis=-2)


if __name__ == "__main__":
    key = jax.random.PRNGKey(0)
    k_x, k_w, k_b, k_x2, k_x3 = jax.random.split(key, 5)

    T, D = 8, 32
    # deterministic "Linear(D, 1)" parameters (PyTorch init ~ U(-1/sqrt(D), 1/sqrt(D)))
    bound = 1.0 / jnp.sqrt(jnp.float32(D))
    w = jax.random.uniform(k_w, (D,), minval=-bound, maxval=bound, dtype=jnp.float32)
    b = jax.random.uniform(k_b, (), minval=-bound, maxval=bound, dtype=jnp.float32)

    # Case 1: plain (B, T, D), f32
    x1 = jax.random.normal(k_x, (2, T, D), dtype=jnp.float32)
    out1 = jax.block_until_ready(attention_pool2(x1, w, b))
    ref1 = attention_pool2_ref(x1, w, b)
    assert out1.shape == (2, D), out1.shape
    assert jnp.allclose(out1, ref1, atol=1e-5, rtol=1e-5), jnp.max(jnp.abs(out1 - ref1))

    # Case 2: extra leading dims -> flattened batch, f32
    x2 = jax.random.normal(k_x2, (4, 4, T, D), dtype=jnp.float32)
    out2 = jax.block_until_ready(attention_pool2(x2, w, b))
    ref2 = attention_pool2_ref(x2, w, b)
    assert out2.shape == (4, 4, D), out2.shape
    assert jnp.allclose(out2, ref2, atol=1e-5, rtol=1e-5), jnp.max(jnp.abs(out2 - ref2))

    # Case 3: bf16 input exercises the low-precision VPU path (v6e/v7x feedback)
    x3 = jax.random.normal(k_x3, (16, T, D), dtype=jnp.float32).astype(jnp.bfloat16)
    out3 = jax.block_until_ready(attention_pool2(x3, w, b))
    ref3 = attention_pool2_ref(x3, w, b)
    assert out3.shape == (16, D), out3.shape
    err3 = jnp.max(jnp.abs(out3.astype(jnp.float32) - ref3))
    assert jnp.allclose(out3.astype(jnp.float32), ref3, atol=5e-2, rtol=5e-2), err3

    print("KERNEL_OK")
</pallas_src>

<mosaic_0001>
module attributes {stable_mosaic.version = 11 : i64} {
  func.func @kernel(%arg0: i32, %arg1: memref<2x8x32xf32, #tpu.memory_space<vmem>>, %arg2: memref<1x32xf32, #tpu.memory_space<vmem>>, %arg3: memref<2x32xf32, #tpu.memory_space<vmem>>, %arg4: memref<2x8xf32, #tpu.memory_space<vmem>>, %arg5: memref<2x32xf32, #tpu.memory_space<vmem>>) attributes {dimension_semantics = [#tpu.dimension_semantics<parallel>], iteration_bounds = array<i64: 1>, scalar_prefetch = 0 : i64, scratch_operands = 2 : i64, tpu.core_type = #tpu.core_type<tc>, window_params = [{transform_indices = @transform_0, window_bounds = array<i64: 2, 8, 32>}, {pipeline_mode = #tpu.pipeline_mode<synchronous>, transform_indices = @transform_1, window_bounds = array<i64: 1, 32>}, {transform_indices = @transform_2, window_bounds = array<i64: 2, 32>}]} {
    %c0 = arith.constant 0 : index
    %c0_0 = arith.constant 0 : index
    %0 = vector.load %arg2[%c0, %c0_0] : memref<1x32xf32, #tpu.memory_space<vmem>>, vector<1x32xf32>
    %c0_1 = arith.constant 0 : index
    %c0_2 = arith.constant 0 : index
    %c0_3 = arith.constant 0 : index
    %1 = vector.load %arg1[%c0_1, %c0_2, %c0_3] : memref<2x8x32xf32, #tpu.memory_space<vmem>>, vector<2x8x32xf32>
    %2 = vector.shape_cast %0 : vector<1x32xf32> to vector<1x1x32xf32>
    %3 = vector.broadcast %2 : vector<1x1x32xf32> to vector<2x8x32xf32>
    %4 = arith.mulf %1, %3 : vector<2x8x32xf32>
    %cst = arith.constant dense<0.000000e+00> : vector<2x8xf32>
    %5 = vector.multi_reduction <add>, %4, %cst [2] : vector<2x8x32xf32> to vector<2x8xf32>
    %c0_4 = arith.constant 0 : index
    %c0_5 = arith.constant 0 : index
    %6 = vector.load %arg4[%c0_4, %c0_5] : memref<2x8xf32, #tpu.memory_space<vmem>>, vector<2x8xf32>
    tpu.vector_store %arg4[%c0_4, %c0_5], %5 {strides = array<i32>} : memref<2x8xf32, #tpu.memory_space<vmem>>, vector<2x8xf32>,
    %c0_6 = arith.constant 0 : index
    %c0_7 = arith.constant 0 : index
    %7 = vector.load %arg4[%c0_6, %c0_7] : memref<2x8xf32, #tpu.memory_space<vmem>>, vector<2x8xf32>
    %cst_8 = arith.constant dense<0xFF800000> : vector<2xf32>
    %8 = vector.multi_reduction <maximumf>, %7, %cst_8 [1] : vector<2x8xf32> to vector<2xf32>
    %9 = vector.shape_cast %8 : vector<2xf32> to vector<2x1xf32>
    %10 = vector.broadcast %9 : vector<2x1xf32> to vector<2x8xf32>
    %11 = arith.subf %7, %10 : vector<2x8xf32>
    %12 = math.exp %11 : vector<2x8xf32>
    %cst_9 = arith.constant dense<0.000000e+00> : vector<2xf32>
    %13 = vector.multi_reduction <add>, %12, %cst_9 [1] : vector<2x8xf32> to vector<2xf32>
    %14 = vector.shape_cast %13 : vector<2xf32> to vector<2x1xf32>
    %15 = tpu.reciprocal %14 : vector<2x1xf32> -> vector<2x1xf32>
    %16 = vector.broadcast %15 : vector<2x1xf32> to vector<2x8xf32>
    %17 = arith.mulf %12, %16 : vector<2x8xf32>
    %c0_10 = arith.constant 0 : index
    %c0_11 = arith.constant 0 : index
    %18 = vector.load %arg4[%c0_10, %c0_11] : memref<2x8xf32, #tpu.memory_space<vmem>>, vector<2x8xf32>
    tpu.vector_store %arg4[%c0_10, %c0_11], %17 {strides = array<i32>} : memref<2x8xf32, #tpu.memory_space<vmem>>, vector<2x8xf32>,
    %cst_12 = arith.constant 0.000000e+00 : f32
    %19 = vector.broadcast %cst_12 : f32 to vector<2x32xf32>
    %c0_13 = arith.constant 0 : index
    %c0_14 = arith.constant 0 : index
    %20 = vector.load %arg5[%c0_13, %c0_14] : memref<2x32xf32, #tpu.memory_space<vmem>>, vector<2x32xf32>
    tpu.vector_store %arg5[%c0_13, %c0_14], %19 {strides = array<i32>} : memref<2x32xf32, #tpu.memory_space<vmem>>, vector<2x32xf32>,
    %c0_15 = arith.constant 0 : index
    %c0_16 = arith.constant 0 : index
    %c0_17 = arith.constant 0 : index
    %21 = vector.load %arg1[%c0_15, %c0_16, %c0_17] : memref<2x8x32xf32, #tpu.memory_space<vmem>>, vector<2x8x32xf32>
    %c0_18 = arith.constant 0 : index
    %c0_19 = arith.constant 0 : index
    %22 = vector.load %arg4[%c0_18, %c0_19] : memref<2x8xf32, #tpu.memory_space<vmem>>, vector<2x8xf32>
    %23 = vector.shape_cast %22 : vector<2x8xf32> to vector<2x8x1xf32>
    %24 = vector.broadcast %23 : vector<2x8x1xf32> to vector<2x8x32xf32>
    %25 = arith.mulf %21, %24 : vector<2x8x32xf32>
    %c0_20 = arith.constant 0 : index
    %c0_21 = arith.constant 0 : index
    %26 = vector.load %arg5[%c0_20, %c0_21] : memref<2x32xf32, #tpu.memory_space<vmem>>, vector<2x32xf32>
    %cst_22 = arith.constant dense<0.000000e+00> : vector<2x32xf32>
    %27 = vector.multi_reduction <add>, %25, %cst_22 [1] : vector<2x8x32xf32> to vector<2x32xf32>
    %28 = arith.addf %26, %27 : vector<2x32xf32>
    %c0_23 = arith.constant 0 : index
    %c0_24 = arith.constant 0 : index
    %29 = vector.load %arg5[%c0_23, %c0_24] : memref<2x32xf32, #tpu.memory_space<vmem>>, vector<2x32xf32>
    tpu.vector_store %arg5[%c0_23, %c0_24], %28 {strides = array<i32>} : memref<2x32xf32, #tpu.memory_space<vmem>>, vector<2x32xf32>,
    %c0_25 = arith.constant 0 : index
    %c0_26 = arith.constant 0 : index
    %30 = vector.load %arg5[%c0_25, %c0_26] : memref<2x32xf32, #tpu.memory_space<vmem>>, vector<2x32xf32>
    %c0_27 = arith.constant 0 : index
    %c0_28 = arith.constant 0 : index
    %31 = vector.load %arg3[%c0_27, %c0_28] : memref<2x32xf32, #tpu.memory_space<vmem>>, vector<2x32xf32>
    tpu.vector_store %arg3[%c0_27, %c0_28], %30 {strides = array<i32>} : memref<2x32xf32, #tpu.memory_space<vmem>>, vector<2x32xf32>,
    return
  }
  func.func @transform_0(%arg0: i32) -> (i32, i32, i32) {
    %c0_i32 = arith.constant 0 : i32
    %c0_i32_0 = arith.constant 0 : i32
    %c0_i32_1 = arith.constant 0 : i32
    return %arg0, %c0_i32, %c0_i32_0 : i32, i32, i32
  }
  func.func @transform_1(%arg0: i32) -> (i32, i32) {
    %c0_i32 = arith.constant 0 : i32
    %c0_i32_0 = arith.constant 0 : i32
    %c0_i32_1 = arith.constant 0 : i32
    return %c0_i32, %c0_i32_0 : i32, i32
  }
  func.func @transform_2(%arg0: i32) -> (i32, i32) {
    %c0_i32 = arith.constant 0 : i32
    %c0_i32_0 = arith.constant 0 : i32
    return %arg0, %c0_i32 : i32, i32
  }
}

</mosaic_0001>

<bundles_post_ra>
// kernel: tpu_custom_call.1
= control target key start
LH: loop header
LB: loop body
LE: loop exit
PB: predicated region body
PF: predicated region fallthrough
CT: control target
= control target key end

     0   :  { %7 = vsyncpa [#allocation5], 0  ;;  %s290_s0 = inlined_call_operand.hbm [shape: f32[2,8,32], index: 0, kind: input, shape index: {}]   ;;  %s291_s1 = inlined_call_operand.hbm [shape: f32[1,32], index: 1, kind: input, shape index: {}]   ;;  %s292_s2 = inlined_call_operand.hbm [shape: f32[2,32], index: 2, kind: output, shape index: {}]  }
   0x1   :  { %8 = vsyncpa [#allocation8], 0 }
   0x2   :  { %9 = vsyncpa [#allocation6], 0  ;;  %s14_s11 = sshll.u32 %s290_s0, 4  ;;  %s247_s12 = smov [#allocation4]   ;;  %s15_s11 = int_to_ptr.hbm [resolvable:$true] %s14_s11 }
   0x3   :  { %s16_s13 = sshll.u32 %s247_s12, 4  ;;  %s28_s16 = sshll.u32 %s291_s1, 4  ;;  %s17_s13 = int_to_ptr.vmem [resolvable:$true] %s16_s13  ;;  %s29_s16 = int_to_ptr.hbm [resolvable:$true] %s28_s16 }
   0x4   :  { %s248_s17 = smov 128   ;;  %s249_s18 = smov 8  }
   0x5   :  { %22 = dma.hbm_to_vmem [thread:$0]  %s15_s11, 256, %s17_s13, [#allocation5], %s248_s17, %s248_s17, %s249_s18  }
   0x6   :  { %s250_s19 = smov [#allocation7]  }
   0x7   :  { %s30_s20 = sshll.u32 %s250_s19, 4  ;;  %s31_s20 = int_to_ptr.vmem [resolvable:$true] %s30_s20 }
   0x8   :  { %33 = dma.hbm_to_vmem [thread:$0]  %s29_s16, 16, %s31_s20, [#allocation8]  }
   0x9   :  { %241 = dma.done.wait [#allocation5], 256  }
   0xa   :  { %242 = vsyncadd [#allocation5], 4294967040 }
   0xb   :  { %243 = dma.done.wait [#allocation8], 16  }
   0xc   :  { %244 = vsyncadd [#allocation8], 4294967280  ;;  %v43_v0 = vld [vmem:[#allocation4] sm:$0xff]  ;;  %v164_v1 = vld [vmem:[#allocation7] ss:$0 sm:$0xff]  ;;  %vm50_vm0 = vcmask 261120   ;;  %v59_v8 = vlaneseq }
   0xd   :  { %v48_v2 = vmul.f32 %v164_v1, %v43_v0  ;;  %v44_v3 = vld [vmem:[#allocation4 + $0x8] sm:$0xff]  ;;  %vm63_vm1 = vcmask 1041409   ;;  %vm66_vm2 = vcmask 58368   ;;  %vm94_vm7 = vcmask 254976   ;;  %s252_s0 = smov [#allocation9]   ;;  %s145_s23 = sshll.u32 %s292_s2, 4  ;;  %s146_s23 = int_to_ptr.hbm [resolvable:$true] %s145_s23 }
   0xe   :  { %v49_v5 = vmul.f32 %v164_v1, %v44_v3  ;;  %v60_v9 = vand.u32 127, %v59_v8  ;;  %v101_v21 = vshrl.u32 %v59_v8, 7  ;;  %v251_v37 = vmov 0.0   ;;  %s143_s1 = sshll.u32 %s252_s0, 4  ;;  %s144_s1 = int_to_ptr.vmem [resolvable:$true] %s143_s1 }
   0xf   :  { %v51_v4 = vsel %vm50_vm0, %v48_v2, 0.0  ;;  %95 = vst.msk [vmem:[#allocation3] sm:$0x3] %vm94_vm7, %v251_v37 }
  0x10   :  { %52 = vadd.xlane.f32.xlu0 %v51_v4  ;;  %v54_v6 = vsel %vm50_vm0, %v49_v5, 0.0  ;;  %162 = vset.pattern.permute.xlu2 %v101_v21 }
  0x11   :  { %163 = vset.pattern.permute.xlu0 %v101_v21 }
  0x16   :  { %v115_v56 = vld [vmem:[#allocation3] sm:$0x3] }
  0x18   :  { %55 = vadd.xlane.f32.xlu0 %v54_v6 }
  0x83   :  { %v53_v7 = vpop.xlane.xlu0 %52 }
  0x84   :  { %v61_v11 = vperm.slane %v53_v7, %v60_v9 }
  0x8b   :  { %v56_v10 = vpop.xlane.xlu0 %55 }
  0x8c   :  { %v62_v12 = vperm.slane %v56_v10, %v60_v9 }
  0x8e   :  { %v64_v13 = vsel %vm63_vm1, %v62_v12, %v61_v11 }
  0x8f   :  { %67 = vst.msk [vmem:[#allocation2] sm:$0x3] %vm66_vm2, %v64_v13 }
  0x96   :  { %v68_v14 = vld [vmem:[#allocation2] sm:$0x3] }
  0x97   :  { %v69_v15 = vsel %vm66_vm2, %v68_v14, -inf }
  0x98   :  { %70 = vmax.xlane.f32.xlu1 %v69_v15 }
 0x10b   :  { %v71_v16 = vpop.xlane.xlu1 %70 }
 0x10c   :  { %v72_v17 = vsub.f32 %v68_v14, %v71_v16 }
 0x10e   :  { %v73_v18 = vmul.f32 1.442695, %v72_v17 }
 0x110   :  { %165 = vpow2.f32 %v73_v18 }
 0x116   :  { %v166_v19 = vpop.eup %165 }
 0x117   :  { %v75_v20 = vsel %vm66_vm2, %v166_v19, 0.0 }
 0x118   :  { %76 = vadd.xlane.f32.xlu1 %v75_v20 }
 0x18b   :  { %v77_v22 = vpop.xlane.xlu1 %76 }
 0x18c   :  { %167 = vrcp.f32 %v77_v22  ;;  %v89_v26 = vand.u32 2147483648, %v77_v22  ;;  %v87_v28 = vand.u32 2147483647, %v77_v22  ;;  %vm83_vm4 = vweird.f32 %v77_v22 }
 0x18e   :  { %v90_v30 = vor.u32 1.1754944e-38, %v89_v26  ;;  %vm88_vm6 = vcmp.eq.f32.partialorder %v87_v28, 8.507059e+37 }
 0x192   :  { %v168_v23 = vpop.eup %167 }
 0x193   :  { %v79_v24 = vmul.f32 %v168_v23, %v77_v22  ;;  %vm84_vm3 = vweird.f32 %v168_v23 }
 0x194   :  { %vm85_vm5 = vmor %vm83_vm4, %vm84_vm3 }
 0x195   :  { %v80_v25 = vsub.f32 1.0, %v79_v24 }
 0x197   :  { %v81_v27 = vmul.f32 %v168_v23, %v80_v25 }
 0x199   :  { %v82_v29 = vadd.f32 %v168_v23, %v81_v27 }
 0x19b   :  { %v86_v31 = vsel %vm85_vm5, %v168_v23, %v82_v29 }
 0x19c   :  { %v91_v32 = vsel %vm88_vm6, %v90_v30, %v86_v31 }
 0x19d   :  { %v92_v33 = vmul.f32 %v166_v19, %v91_v32 }
 0x19f   :  { %93 = vst.msk [vmem:[#allocation2] sm:$0x3] %vm66_vm2, %v92_v33 }
 0x1a6   :  { %v98_v34 = vld [vmem:[#allocation2] sm:$0x3] }
 0x1a7   :  { %v99_v35 = vperm.slane %v98_v34, 0  ;;  %v106_v36 = vperm.slane %v98_v34, 1 }
 0x1a9   :  { %104 = vperm.xlu2 %162, %v99_v35  }
 0x1b1   :  { %111 = vperm.xlu2 %162, %v106_v36  }
 0x203   :  { %v105_v38 = vpop.permute.xlu2 %104 }
 0x204   :  { %v113_v39 = vmul.f32 %v105_v38, %v43_v0 }
 0x206   :  { %v116_v40 = vsel %vm50_vm0, %v113_v39, 0.0 }
 0x207   :  { %v117_v41 = vrot.slane %v116_v40, 4 }
 0x209   :  { %v118_v42 = vadd.f32 %v117_v41, %v116_v40 }
 0x20b   :  { %v112_v43 = vpop.permute.xlu2 %111  ;;  %v119_v45 = vrot.slane %v118_v42, 2 }
 0x20c   :  { %v114_v44 = vmul.f32 %v112_v43, %v44_v3 }
 0x20d   :  { %v120_v48 = vadd.f32 %v119_v45, %v118_v42 }
 0x20e   :  { %v123_v46 = vsel %vm50_vm0, %v114_v44, 0.0 }
 0x20f   :  { %v124_v47 = vrot.slane %v123_v46, 4  ;;  %v121_v51 = vrot.slane %v120_v48, 1 }
 0x211   :  { %v125_v49 = vadd.f32 %v124_v47, %v123_v46  ;;  %v122_v54 = vadd.f32 %v121_v51, %v120_v48 }
 0x213   :  { %v126_v50 = vrot.slane %v125_v49, 2 }
 0x215   :  { %v127_v52 = vadd.f32 %v126_v50, %v125_v49 }
 0x217   :  { %v128_v53 = vrot.slane %v127_v52, 1 }
 0x219   :  { %v129_v55 = vadd.f32 %v128_v53, %v127_v52 }
 0x21b   :  { %v132_v57 = vsel %vm63_vm1, %v129_v55, %v122_v54 }
 0x21c   :  { %v134_v58 = vadd.f32 %v132_v57, %v115_v56 }
 0x21e   :  { %135 = vst.msk [vmem:[#allocation3] sm:$0x3] %vm94_vm7, %v134_v58 }
 0x225   :  { %v136_v59 = vld [vmem:[#allocation3] sm:$0x3] }
 0x226   :  { %137 = vst.msk [vmem:[#allocation9] sm:$0x3] %vm94_vm7, %v136_v59 }
 0x227   :  { %148 = dma.vmem_to_hbm [thread:$0]  %s144_s1, 32, %s146_s23, [#allocation6]  }
 0x228   :  { %245 = dma.done.wait [#allocation6], 32  }
 0x229   :  { %246 = vsyncadd [#allocation6], 4294967264 }
 0x22a   :  { %153 = vsyncpa [#allocation5], 1 }
 0x22b   :  { %154 = vsyncpa [#allocation8], 1 }
 0x22c   :  { %155 = vsyncpa [#allocation6], 1 }

</bundles_post_ra>
